<compile_context>
chip_gen: v5e
topology: v5e:2x2
jax: 0.10.0
libtpu: 0.0.40
codegen_flags: <defaults>
</compile_context>

<pallas_src>
import jax
import jax.numpy as jnp
from jax.experimental import pallas as pl
from jax.experimental.pallas import tpu as pltpu

_GRAY_R, _GRAY_G, _GRAY_B = 0.2989, 0.587, 0.114
_LANE = 128
_SUBLANE = 8
_MAX_TILE_ROWS = 2048    # 2048 x 128 px per tile -> 3 MiB per f32 3-plane buffer


def _color_jitter_kernel(fac_ref, x_ref, o_ref):
    """fac_ref: SMEM (B*6,) f32 per-image
         [apply, brightness, contrast, saturation, 1 + hue, gray_mean]
       x_ref / o_ref: VMEM (1, 3, T, 128) tiles (one HW tile of one image)."""
    b = pl.program_id(0)
    base = b * 6
    apply_f = fac_ref[base + 0]
    bright_f = fac_ref[base + 1]
    contrast_f = fac_ref[base + 2]
    sat_f = fac_ref[base + 3]
    hshift = fac_ref[base + 4]        # 1.0 + hue_factor (folded in the wrapper)
    gray_mean = fac_ref[base + 5]     # per-image mean of grayscale(brightness(x))

    @pl.when(apply_f <= 0.5)
    def _():                          # pass-through (prob. epsilon)
        o_ref[...] = x_ref[...]

    @pl.when(apply_f > 0.5)
    def _():
        # Dense (T, 128) channel planes; compute in f32 at the vreg boundary.
        r = x_ref[0, 0, :, :].astype(jnp.float32)
        g = x_ref[0, 1, :, :].astype(jnp.float32)
        bl = x_ref[0, 2, :, :].astype(jnp.float32)

        # --- brightness: blend(img, zeros, f) = clamp(img * f, 0, 1) ---
        # img >= 0 and f > 0, so only the upper clamp is needed.
        r = jnp.minimum(r * bright_f, 1.0)
        g = jnp.minimum(g * bright_f, 1.0)
        bl = jnp.minimum(bl * bright_f, 1.0)

        # --- contrast: blend(img, mean(grayscale(img)), f); mean hoisted ---
        c_off = (1.0 - contrast_f) * gray_mean            # scalar
        r = jnp.clip(contrast_f * r + c_off, 0.0, 1.0)
        g = jnp.clip(contrast_f * g + c_off, 0.0, 1.0)
        bl = jnp.clip(contrast_f * bl + c_off, 0.0, 1.0)

        # --- saturation: blend(img, grayscale(img), f) ---
        gray = _GRAY_R * r + _GRAY_G * g + _GRAY_B * bl
        s_off = (1.0 - sat_f) * gray                      # one vector mul, reused 3x
        r = jnp.clip(sat_f * r + s_off, 0.0, 1.0)
        g = jnp.clip(sat_f * g + s_off, 0.0, 1.0)
        bl = jnp.clip(sat_f * bl + s_off, 0.0, 1.0)

        # --- hue: RGB -> HSV, shift hue (mod 1), HSV -> RGB ---
        # Rewritten in (minc, maxc, chroma) form: v = maxc, p = minc,
        # q = maxc - cr*f, t = minc + cr*f -> no saturation value, one EUP recip.
        maxc = jnp.maximum(jnp.maximum(r, g), bl)
        minc = jnp.minimum(jnp.minimum(r, g), bl)
        cr = maxc - minc
        eqc = cr == 0.0
        inv_cr = pl.reciprocal(jnp.where(eqc, 1.0, cr), approx=True)   # EUP slot
        rc = (maxc - r) * inv_cr
        gc = (maxc - g) * inv_cr
        bc = (maxc - bl) * inv_cr
        mr = maxc == r
        mg = maxc == g
        not_mr = jnp.logical_not(mr)
        hr = jnp.where(mr, bc - gc, 0.0)
        hg = jnp.where(mg & not_mr, 2.0 + rc - bc, 0.0)
        hb = jnp.where(jnp.logical_not(mg) & not_mr, 4.0 + gc - rc, 0.0)
        h = (hr + hg + hb) * (1.0 / 6.0) + hshift
        h = h - jnp.floor(h)                              # fused (mod 1) + hue shift

        h6 = h * 6.0
        i_f = jnp.minimum(jnp.floor(h6), 5.0)             # fp-edge guard
        f = h6 - i_f
        crf = cr * f
        v = maxc
        p = minc                                          # exact, already in [0, 1]
        q = maxc - crf
        t = minc + crf

        m0 = i_f == 0.0                                   # shared sector masks
        m1 = i_f == 1.0
        m2 = i_f == 2.0
        m3 = i_f == 3.0
        m4 = i_f == 4.0

        def sel(o0, o1, o2, o3, o4, o5):
            return jnp.where(m0, o0, jnp.where(m1, o1, jnp.where(
                m2, o2, jnp.where(m3, o3, jnp.where(m4, o4, o5)))))

        dt = o_ref.dtype
        o_ref[0, 0, :, :] = sel(v, q, p, p, t, v).astype(dt)   # per-channel stores
        o_ref[0, 1, :, :] = sel(t, v, v, q, p, p).astype(dt)
        o_ref[0, 2, :, :] = sel(p, p, t, v, v, q).astype(dt)


def batchwise_image_color_jitter(x, key, *, brightness=0.3, contrast=0.3,
                                 saturation=0.3, hue=0.3, epsilon=0.1,
                                 training=True):
    """x: (B, 3, H, W) float (f32 or bf16) in [0, 1] (NCHW, matching the module)."""
    if not training:
        return x        # eval path: module always passes the batch through unchanged

    B, C, H, W = x.shape
    assert C == 3, "ColorJitter needs RGB images"
    HW = H * W
    x_flat = x.reshape(B, C, HW)        # keep input dtype (bf16 stays bf16 in HBM)

    # Per-image random jitter parameters (mirrors ColorJitter.get_params).
    k1, k2, k3, k4, k5 = jax.random.split(key, 5)
    bf = jax.random.uniform(k1, (B,), minval=1.0 - brightness, maxval=1.0 + brightness)
    cf = jax.random.uniform(k2, (B,), minval=1.0 - contrast, maxval=1.0 + contrast)
    sf = jax.random.uniform(k3, (B,), minval=1.0 - saturation, maxval=1.0 + saturation)
    hf = jax.random.uniform(k4, (B,), minval=-hue, maxval=hue)
    apply_flag = (jax.random.uniform(k5, (B,)) > epsilon).astype(jnp.float32)

    # Contrast uses the *global* per-image mean of grayscale(brightness(x)); hoist it
    # here as one fused elementwise->reduce pass (no brightness copy materialized).
    bcol = bf[:, None].astype(jnp.float32)
    gray_mean = jnp.mean(
        _GRAY_R * jnp.minimum(x_flat[:, 0].astype(jnp.float32) * bcol, 1.0)
        + _GRAY_G * jnp.minimum(x_flat[:, 1].astype(jnp.float32) * bcol, 1.0)
        + _GRAY_B * jnp.minimum(x_flat[:, 2].astype(jnp.float32) * bcol, 1.0),
        axis=-1)

    # 1-D scalar-prefetch table: 6 scalars per image (avoids 2-D SMEM padding).
    factors = jnp.stack(
        [apply_flag, bf, cf, sf, 1.0 + hf, gray_mean], axis=1
    ).reshape(B * 6).astype(jnp.float32)

    # Lane-dense layout: (B, 3, rows, 128).  Pick n_tiles first, then tile_rows, so
    # padding waste is <= 8*(n_tiles-1) rows; skip pad/slice when already aligned.
    rows = pl.cdiv(pl.cdiv(HW, _LANE), _SUBLANE) * _SUBLANE
    n_tiles = pl.cdiv(rows, _MAX_TILE_ROWS)
    if B * n_tiles < 2 and rows >= 2 * _SUBLANE:
        n_tiles = 2                      # keep both v7x TensorCores fed
    tile_rows = pl.cdiv(pl.cdiv(rows, n_tiles), _SUBLANE) * _SUBLANE
    rows_pad = tile_rows * n_tiles
    hw_pad = rows_pad * _LANE

    if hw_pad != HW:
        x_flat = jnp.pad(x_flat, ((0, 0), (0, 0), (0, hw_pad - HW)))
    x_planes = x_flat.reshape(B, C, rows_pad, _LANE)

    out_planes = pl.pallas_call(
        _color_jitter_kernel,
        out_shape=jax.ShapeDtypeStruct((B, C, rows_pad, _LANE), x.dtype),
        grid_spec=pltpu.PrefetchScalarGridSpec(
            num_scalar_prefetch=1,                               # factors -> SMEM
            grid=(B, n_tiles),
            in_specs=[pl.BlockSpec((1, C, tile_rows, _LANE),
                                   lambda b, t, fac: (b, 0, t, 0))],
            out_specs=pl.BlockSpec((1, C, tile_rows, _LANE),
                                   lambda b, t, fac: (b, 0, t, 0)),
        ),
        compiler_params=pltpu.CompilerParams(
            dimension_semantics=("parallel", "parallel")),
    )(factors, x_planes)

    out = out_planes.reshape(B, C, hw_pad)
    if hw_pad != HW:
        out = out[:, :, :HW]
    return out.reshape(B, C, H, W)


if __name__ == "__main__":
    key = jax.random.PRNGKey(0)
    kx, kj = jax.random.split(key)
    # Small shape consistent with the module: batch=2, RGB channels=3, 16x16 images.
    x = jax.random.uniform(kx, (2, 3, 16, 16), dtype=jnp.float32)

    out = batchwise_image_color_jitter(x, kj, training=True)
    out = jax.block_until_ready(out)

    assert out.shape == x.shape and out.dtype == x.dtype
    assert bool(jnp.all(jnp.isfinite(out)))
    assert bool(jnp.all((out >= 0.0) & (out <= 1.0)))
    print("KERNEL_OK")
</pallas_src>

<mosaic_0001>
module attributes {stable_mosaic.version = 11 : i64} {
  func.func @_color_jitter_kernel(%arg0: i32, %arg1: i32, %arg2: memref<12xf32, #tpu.memory_space<smem>>, %arg3: memref<1x3x8x128xf32, #tpu.memory_space<vmem>>, %arg4: memref<1x3x8x128xf32, #tpu.memory_space<vmem>>) attributes {dimension_semantics = [#tpu.dimension_semantics<parallel>, #tpu.dimension_semantics<parallel>], iteration_bounds = array<i64: 2, 1>, scalar_prefetch = 1 : i64, scratch_operands = 0 : i64, tpu.core_type = #tpu.core_type<tc>, window_params = [{transform_indices = @transform_0, window_bounds = array<i64: 1, 3, 8, 128>}, {transform_indices = @transform_1, window_bounds = array<i64: 1, 3, 8, 128>}]} {
    %c6_i32 = arith.constant 6 : i32
    %0 = arith.muli %arg0, %c6_i32 : i32
    %c0_i32 = arith.constant 0 : i32
    %1 = arith.addi %0, %c0_i32 : i32
    %2 = arith.index_cast %1 : i32 to index
    %3 = memref.load %arg2[%2] : memref<12xf32, #tpu.memory_space<smem>>
    %c1_i32 = arith.constant 1 : i32
    %4 = arith.addi %0, %c1_i32 : i32
    %5 = arith.index_cast %4 : i32 to index
    %6 = memref.load %arg2[%5] : memref<12xf32, #tpu.memory_space<smem>>
    %c2_i32 = arith.constant 2 : i32
    %7 = arith.addi %0, %c2_i32 : i32
    %8 = arith.index_cast %7 : i32 to index
    %9 = memref.load %arg2[%8] : memref<12xf32, #tpu.memory_space<smem>>
    %c3_i32 = arith.constant 3 : i32
    %10 = arith.addi %0, %c3_i32 : i32
    %11 = arith.index_cast %10 : i32 to index
    %12 = memref.load %arg2[%11] : memref<12xf32, #tpu.memory_space<smem>>
    %c4_i32 = arith.constant 4 : i32
    %13 = arith.addi %0, %c4_i32 : i32
    %14 = arith.index_cast %13 : i32 to index
    %15 = memref.load %arg2[%14] : memref<12xf32, #tpu.memory_space<smem>>
    %c5_i32 = arith.constant 5 : i32
    %16 = arith.addi %0, %c5_i32 : i32
    %17 = arith.index_cast %16 : i32 to index
    %18 = memref.load %arg2[%17] : memref<12xf32, #tpu.memory_space<smem>>
    %cst = arith.constant 5.000000e-01 : f32
    %19 = arith.cmpf ole, %3, %cst : f32
    %20 = arith.extui %19 : i1 to i32
    %c0_i32_0 = arith.constant 0 : i32
    %21 = arith.cmpi ne, %20, %c0_i32_0 : i32
    scf.if %21 {
      %c0 = arith.constant 0 : index
      %c0_3 = arith.constant 0 : index
      %c0_4 = arith.constant 0 : index
      %c0_5 = arith.constant 0 : index
      %25 = vector.load %arg3[%c0, %c0_3, %c0_4, %c0_5] : memref<1x3x8x128xf32, #tpu.memory_space<vmem>>, vector<1x3x8x128xf32>
      %c0_6 = arith.constant 0 : index
      %c0_7 = arith.constant 0 : index
      %c0_8 = arith.constant 0 : index
      %c0_9 = arith.constant 0 : index
      %26 = vector.load %arg4[%c0_6, %c0_7, %c0_8, %c0_9] : memref<1x3x8x128xf32, #tpu.memory_space<vmem>>, vector<1x3x8x128xf32>
      tpu.vector_store %arg4[%c0_6, %c0_7, %c0_8, %c0_9], %25 {strides = array<i32>} : memref<1x3x8x128xf32, #tpu.memory_space<vmem>>, vector<1x3x8x128xf32>,
    } else {
    }
    %cst_1 = arith.constant 5.000000e-01 : f32
    %22 = arith.cmpf ogt, %3, %cst_1 : f32
    %23 = arith.extui %22 : i1 to i32
    %c0_i32_2 = arith.constant 0 : i32
    %24 = arith.cmpi ne, %23, %c0_i32_2 : i32
    scf.if %24 {
      %c0 = arith.constant 0 : index
      %c0_3 = arith.constant 0 : index
      %c0_4 = arith.constant 0 : index
      %c0_5 = arith.constant 0 : index
      %25 = vector.load %arg3[%c0, %c0_3, %c0_4, %c0_5] : memref<1x3x8x128xf32, #tpu.memory_space<vmem>>, vector<1x1x8x128xf32>
      %26 = vector.shape_cast %25 : vector<1x1x8x128xf32> to vector<8x128xf32>
      %c0_6 = arith.constant 0 : index
      %c1 = arith.constant 1 : index
      %c0_7 = arith.constant 0 : index
      %c0_8 = arith.constant 0 : index
      %27 = vector.load %arg3[%c0_6, %c1, %c0_7, %c0_8] : memref<1x3x8x128xf32, #tpu.memory_space<vmem>>, vector<1x1x8x128xf32>
      %28 = vector.shape_cast %27 : vector<1x1x8x128xf32> to vector<8x128xf32>
      %c0_9 = arith.constant 0 : index
      %c2 = arith.constant 2 : index
      %c0_10 = arith.constant 0 : index
      %c0_11 = arith.constant 0 : index
      %29 = vector.load %arg3[%c0_9, %c2, %c0_10, %c0_11] : memref<1x3x8x128xf32, #tpu.memory_space<vmem>>, vector<1x1x8x128xf32>
      %30 = vector.shape_cast %29 : vector<1x1x8x128xf32> to vector<8x128xf32>
      %31 = vector.broadcast %6 : f32 to vector<8x128xf32>
      %32 = arith.mulf %26, %31 : vector<8x128xf32>
      %cst_12 = arith.constant 1.000000e+00 : f32
      %33 = vector.broadcast %cst_12 : f32 to vector<8x128xf32>
      %34 = arith.minimumf %32, %33 : vector<8x128xf32>
      %35 = vector.broadcast %6 : f32 to vector<8x128xf32>
      %36 = arith.mulf %28, %35 : vector<8x128xf32>
      %cst_13 = arith.constant 1.000000e+00 : f32
      %37 = vector.broadcast %cst_13 : f32 to vector<8x128xf32>
      %38 = arith.minimumf %36, %37 : vector<8x128xf32>
      %39 = vector.broadcast %6 : f32 to vector<8x128xf32>
      %40 = arith.mulf %30, %39 : vector<8x128xf32>
      %cst_14 = arith.constant 1.000000e+00 : f32
      %41 = vector.broadcast %cst_14 : f32 to vector<8x128xf32>
      %42 = arith.minimumf %40, %41 : vector<8x128xf32>
      %cst_15 = arith.constant 1.000000e+00 : f32
      %43 = arith.subf %cst_15, %9 : f32
      %44 = arith.mulf %43, %18 : f32
      %45 = vector.broadcast %9 : f32 to vector<8x128xf32>
      %46 = arith.mulf %45, %34 : vector<8x128xf32>
      %47 = vector.broadcast %44 : f32 to vector<8x128xf32>
      %48 = arith.addf %46, %47 : vector<8x128xf32>
      %cst_16 = arith.constant 0.000000e+00 : f32
      %cst_17 = arith.constant 1.000000e+00 : f32
      %49 = vector.broadcast %cst_16 : f32 to vector<8x128xf32>
      %50 = arith.maximumf %49, %48 : vector<8x128xf32>
      %51 = vector.broadcast %cst_17 : f32 to vector<8x128xf32>
      %52 = arith.minimumf %51, %50 : vector<8x128xf32>
      %53 = vector.broadcast %9 : f32 to vector<8x128xf32>
      %54 = arith.mulf %53, %38 : vector<8x128xf32>
      %55 = vector.broadcast %44 : f32 to vector<8x128xf32>
      %56 = arith.addf %54, %55 : vector<8x128xf32>
      %cst_18 = arith.constant 0.000000e+00 : f32
      %cst_19 = arith.constant 1.000000e+00 : f32
      %57 = vector.broadcast %cst_18 : f32 to vector<8x128xf32>
      %58 = arith.maximumf %57, %56 : vector<8x128xf32>
      %59 = vector.broadcast %cst_19 : f32 to vector<8x128xf32>
      %60 = arith.minimumf %59, %58 : vector<8x128xf32>
      %61 = vector.broadcast %9 : f32 to vector<8x128xf32>
      %62 = arith.mulf %61, %42 : vector<8x128xf32>
      %63 = vector.broadcast %44 : f32 to vector<8x128xf32>
      %64 = arith.addf %62, %63 : vector<8x128xf32>
      %cst_20 = arith.constant 0.000000e+00 : f32
      %cst_21 = arith.constant 1.000000e+00 : f32
      %65 = vector.broadcast %cst_20 : f32 to vector<8x128xf32>
      %66 = arith.maximumf %65, %64 : vector<8x128xf32>
      %67 = vector.broadcast %cst_21 : f32 to vector<8x128xf32>
      %68 = arith.minimumf %67, %66 : vector<8x128xf32>
      %cst_22 = arith.constant 2.989000e-01 : f32
      %69 = vector.broadcast %cst_22 : f32 to vector<8x128xf32>
      %70 = arith.mulf %69, %52 : vector<8x128xf32>
      %cst_23 = arith.constant 5.870000e-01 : f32
      %71 = vector.broadcast %cst_23 : f32 to vector<8x128xf32>
      %72 = arith.mulf %71, %60 : vector<8x128xf32>
      %73 = arith.addf %70, %72 : vector<8x128xf32>
      %cst_24 = arith.constant 1.140000e-01 : f32
      %74 = vector.broadcast %cst_24 : f32 to vector<8x128xf32>
      %75 = arith.mulf %74, %68 : vector<8x128xf32>
      %76 = arith.addf %73, %75 : vector<8x128xf32>
      %cst_25 = arith.constant 1.000000e+00 : f32
      %77 = arith.subf %cst_25, %12 : f32
      %78 = vector.broadcast %77 : f32 to vector<8x128xf32>
      %79 = arith.mulf %78, %76 : vector<8x128xf32>
      %80 = vector.broadcast %12 : f32 to vector<8x128xf32>
      %81 = arith.mulf %80, %52 : vector<8x128xf32>
      %82 = arith.addf %81, %79 : vector<8x128xf32>
      %cst_26 = arith.constant 0.000000e+00 : f32
      %cst_27 = arith.constant 1.000000e+00 : f32
      %83 = vector.broadcast %cst_26 : f32 to vector<8x128xf32>
      %84 = arith.maximumf %83, %82 : vector<8x128xf32>
      %85 = vector.broadcast %cst_27 : f32 to vector<8x128xf32>
      %86 = arith.minimumf %85, %84 : vector<8x128xf32>
      %87 = vector.broadcast %12 : f32 to vector<8x128xf32>
      %88 = arith.mulf %87, %60 : vector<8x128xf32>
      %89 = arith.addf %88, %79 : vector<8x128xf32>
      %cst_28 = arith.constant 0.000000e+00 : f32
      %cst_29 = arith.constant 1.000000e+00 : f32
      %90 = vector.broadcast %cst_28 : f32 to vector<8x128xf32>
      %91 = arith.maximumf %90, %89 : vector<8x128xf32>
      %92 = vector.broadcast %cst_29 : f32 to vector<8x128xf32>
      %93 = arith.minimumf %92, %91 : vector<8x128xf32>
      %94 = vector.broadcast %12 : f32 to vector<8x128xf32>
      %95 = arith.mulf %94, %68 : vector<8x128xf32>
      %96 = arith.addf %95, %79 : vector<8x128xf32>
      %cst_30 = arith.constant 0.000000e+00 : f32
      %cst_31 = arith.constant 1.000000e+00 : f32
      %97 = vector.broadcast %cst_30 : f32 to vector<8x128xf32>
      %98 = arith.maximumf %97, %96 : vector<8x128xf32>
      %99 = vector.broadcast %cst_31 : f32 to vector<8x128xf32>
      %100 = arith.minimumf %99, %98 : vector<8x128xf32>
      %101 = arith.maximumf %86, %93 : vector<8x128xf32>
      %102 = arith.maximumf %101, %100 : vector<8x128xf32>
      %103 = arith.minimumf %86, %93 : vector<8x128xf32>
      %104 = arith.minimumf %103, %100 : vector<8x128xf32>
      %105 = arith.subf %102, %104 : vector<8x128xf32>
      %cst_32 = arith.constant 0.000000e+00 : f32
      %106 = vector.broadcast %cst_32 : f32 to vector<8x128xf32>
      %107 = arith.cmpf oeq, %105, %106 : vector<8x128xf32>
      %cst_33 = arith.constant 1.000000e+00 : f32
      %108 = vector.broadcast %cst_33 : f32 to vector<8x128xf32>
      %109 = arith.select %107, %108, %105 : vector<8x128xi1>, vector<8x128xf32>
      %110 = tpu.reciprocal %109 {approx = true} : vector<8x128xf32> -> vector<8x128xf32>
      %111 = arith.subf %102, %86 : vector<8x128xf32>
      %112 = arith.mulf %111, %110 : vector<8x128xf32>
      %113 = arith.subf %102, %93 : vector<8x128xf32>
      %114 = arith.mulf %113, %110 : vector<8x128xf32>
      %115 = arith.subf %102, %100 : vector<8x128xf32>
      %116 = arith.mulf %115, %110 : vector<8x128xf32>
      %117 = arith.cmpf oeq, %102, %86 : vector<8x128xf32>
      %118 = arith.cmpf oeq, %102, %93 : vector<8x128xf32>
      %cst_34 = arith.constant dense<true> : vector<8x128xi1>
      %119 = arith.xori %117, %cst_34 : vector<8x128xi1>
      %120 = arith.subf %116, %114 : vector<8x128xf32>
      %cst_35 = arith.constant 0.000000e+00 : f32
      %121 = vector.broadcast %cst_35 : f32 to vector<8x128xf32>
      %122 = arith.select %117, %120, %121 : vector<8x128xi1>, vector<8x128xf32>
      %123 = arith.andi %118, %119 : vector<8x128xi1>
      %cst_36 = arith.constant 2.000000e+00 : f32
      %124 = vector.broadcast %cst_36 : f32 to vector<8x128xf32>
      %125 = arith.addf %124, %112 : vector<8x128xf32>
      %126 = arith.subf %125, %116 : vector<8x128xf32>
      %cst_37 = arith.constant 0.000000e+00 : f32
      %127 = vector.broadcast %cst_37 : f32 to vector<8x128xf32>
      %128 = arith.select %123, %126, %127 : vector<8x128xi1>, vector<8x128xf32>
      %cst_38 = arith.constant dense<true> : vector<8x128xi1>
      %129 = arith.xori %118, %cst_38 : vector<8x128xi1>
      %130 = arith.andi %129, %119 : vector<8x128xi1>
      %cst_39 = arith.constant 4.000000e+00 : f32
      %131 = vector.broadcast %cst_39 : f32 to vector<8x128xf32>
      %132 = arith.addf %131, %114 : vector<8x128xf32>
      %133 = arith.subf %132, %112 : vector<8x128xf32>
      %cst_40 = arith.constant 0.000000e+00 : f32
      %134 = vector.broadcast %cst_40 : f32 to vector<8x128xf32>
      %135 = arith.select %130, %133, %134 : vector<8x128xi1>, vector<8x128xf32>
      %136 = arith.addf %122, %128 : vector<8x128xf32>
      %137 = arith.addf %136, %135 : vector<8x128xf32>
      %cst_41 = arith.constant 0.166666672 : f32
      %138 = vector.broadcast %cst_41 : f32 to vector<8x128xf32>
      %139 = arith.mulf %137, %138 : vector<8x128xf32>
      %140 = vector.broadcast %15 : f32 to vector<8x128xf32>
      %141 = arith.addf %139, %140 : vector<8x128xf32>
      %142 = math.floor %141 : vector<8x128xf32>
      %143 = arith.subf %141, %142 : vector<8x128xf32>
      %cst_42 = arith.constant 6.000000e+00 : f32
      %144 = vector.broadcast %cst_42 : f32 to vector<8x128xf32>
      %145 = arith.mulf %143, %144 : vector<8x128xf32>
      %146 = math.floor %145 : vector<8x128xf32>
      %cst_43 = arith.constant 5.000000e+00 : f32
      %147 = vector.broadcast %cst_43 : f32 to vector<8x128xf32>
      %148 = arith.minimumf %146, %147 : vector<8x128xf32>
      %149 = arith.subf %145, %148 : vector<8x128xf32>
      %150 = arith.mulf %105, %149 : vector<8x128xf32>
      %151 = arith.subf %102, %150 : vector<8x128xf32>
      %152 = arith.addf %104, %150 : vector<8x128xf32>
      %cst_44 = arith.constant 0.000000e+00 : f32
      %153 = vector.broadcast %cst_44 : f32 to vector<8x128xf32>
      %154 = arith.cmpf oeq, %148, %153 : vector<8x128xf32>
      %cst_45 = arith.constant 1.000000e+00 : f32
      %155 = vector.broadcast %cst_45 : f32 to vector<8x128xf32>
      %156 = arith.cmpf oeq, %148, %155 : vector<8x128xf32>
      %cst_46 = arith.constant 2.000000e+00 : f32
      %157 = vector.broadcast %cst_46 : f32 to vector<8x128xf32>
      %158 = arith.cmpf oeq, %148, %157 : vector<8x128xf32>
      %cst_47 = arith.constant 3.000000e+00 : f32
      %159 = vector.broadcast %cst_47 : f32 to vector<8x128xf32>
      %160 = arith.cmpf oeq, %148, %159 : vector<8x128xf32>
      %cst_48 = arith.constant 4.000000e+00 : f32
      %161 = vector.broadcast %cst_48 : f32 to vector<8x128xf32>
      %162 = arith.cmpf oeq, %148, %161 : vector<8x128xf32>
      %163 = arith.select %162, %152, %102 : vector<8x128xi1>, vector<8x128xf32>
      %164 = arith.select %160, %104, %163 : vector<8x128xi1>, vector<8x128xf32>
      %165 = arith.select %158, %104, %164 : vector<8x128xi1>, vector<8x128xf32>
      %166 = arith.select %156, %151, %165 : vector<8x128xi1>, vector<8x128xf32>
      %167 = arith.select %154, %102, %166 : vector<8x128xi1>, vector<8x128xf32>
      %c0_49 = arith.constant 0 : index
      %c0_50 = arith.constant 0 : index
      %c0_51 = arith.constant 0 : index
      %c0_52 = arith.constant 0 : index
      %168 = vector.load %arg4[%c0_49, %c0_50, %c0_51, %c0_52] : memref<1x3x8x128xf32, #tpu.memory_space<vmem>>, vector<1x1x8x128xf32>
      %169 = vector.shape_cast %168 : vector<1x1x8x128xf32> to vector<8x128xf32>
      %170 = vector.shape_cast %167 : vector<8x128xf32> to vector<1x1x8x128xf32>
      tpu.vector_store %arg4[%c0_49, %c0_50, %c0_51, %c0_52], %170 {strides = array<i32>} : memref<1x3x8x128xf32, #tpu.memory_space<vmem>>, vector<1x1x8x128xf32>,
      %171 = arith.select %162, %104, %104 : vector<8x128xi1>, vector<8x128xf32>
      %172 = arith.select %160, %151, %171 : vector<8x128xi1>, vector<8x128xf32>
      %173 = arith.select %158, %102, %172 : vector<8x128xi1>, vector<8x128xf32>
      %174 = arith.select %156, %102, %173 : vector<8x128xi1>, vector<8x128xf32>
      %175 = arith.select %154, %152, %174 : vector<8x128xi1>, vector<8x128xf32>
      %c0_53 = arith.constant 0 : index
      %c1_54 = arith.constant 1 : index
      %c0_55 = arith.constant 0 : index
      %c0_56 = arith.constant 0 : index
      %176 = vector.load %arg4[%c0_53, %c1_54, %c0_55, %c0_56] : memref<1x3x8x128xf32, #tpu.memory_space<vmem>>, vector<1x1x8x128xf32>
      %177 = vector.shape_cast %176 : vector<1x1x8x128xf32> to vector<8x128xf32>
      %178 = vector.shape_cast %175 : vector<8x128xf32> to vector<1x1x8x128xf32>
      tpu.vector_store %arg4[%c0_53, %c1_54, %c0_55, %c0_56], %178 {strides = array<i32>} : memref<1x3x8x128xf32, #tpu.memory_space<vmem>>, vector<1x1x8x128xf32>,
      %179 = arith.select %162, %102, %151 : vector<8x128xi1>, vector<8x128xf32>
      %180 = arith.select %160, %102, %179 : vector<8x128xi1>, vector<8x128xf32>
      %181 = arith.select %158, %152, %180 : vector<8x128xi1>, vector<8x128xf32>
      %182 = arith.select %156, %104, %181 : vector<8x128xi1>, vector<8x128xf32>
      %183 = arith.select %154, %104, %182 : vector<8x128xi1>, vector<8x128xf32>
      %c0_57 = arith.constant 0 : index
      %c2_58 = arith.constant 2 : index
      %c0_59 = arith.constant 0 : index
      %c0_60 = arith.constant 0 : index
      %184 = vector.load %arg4[%c0_57, %c2_58, %c0_59, %c0_60] : memref<1x3x8x128xf32, #tpu.memory_space<vmem>>, vector<1x1x8x128xf32>
      %185 = vector.shape_cast %184 : vector<1x1x8x128xf32> to vector<8x128xf32>
      %186 = vector.shape_cast %183 : vector<8x128xf32> to vector<1x1x8x128xf32>
      tpu.vector_store %arg4[%c0_57, %c2_58, %c0_59, %c0_60], %186 {strides = array<i32>} : memref<1x3x8x128xf32, #tpu.memory_space<vmem>>, vector<1x1x8x128xf32>,
    } else {
    }
    return
  }
  func.func @transform_0(%arg0: i32, %arg1: i32, %arg2: memref<12xf32, #tpu.memory_space<smem>>) -> (i32, i32, i32, i32) {
    %c0_i32 = arith.constant 0 : i32
    %c0_i32_0 = arith.constant 0 : i32
    %c0_i32_1 = arith.constant 0 : i32
    return %arg0, %c0_i32, %arg1, %c0_i32_0 : i32, i32, i32, i32
  }
  func.func @transform_1(%arg0: i32, %arg1: i32, %arg2: memref<12xf32, #tpu.memory_space<smem>>) -> (i32, i32, i32, i32) {
    %c0_i32 = arith.constant 0 : i32
    %c0_i32_0 = arith.constant 0 : i32
    %c0_i32_1 = arith.constant 0 : i32
    return %arg0, %c0_i32, %arg1, %c0_i32_0 : i32, i32, i32, i32
  }
}

</mosaic_0001>

<bundles_post_ra>
// kernel: tpu_custom_call.1
= control target key start
LH: loop header
LB: loop body
LE: loop exit
PB: predicated region body
PF: predicated region fallthrough
CT: control target
= control target key end

     0   :  { %s621_s12 = smov [#allocation3]   ;;  %s782_s0 = inlined_call_operand.hbm [shape: f32[12], index: 0, kind: input, shape index: {}]   ;;  %s783_s1 = inlined_call_operand.hbm [shape: f32[2,3,8,128], index: 1, kind: input, shape index: {}]   ;;  %s784_s2 = inlined_call_operand.hbm [shape: f32[2,3,8,128], index: 2, kind: output, shape index: {}]  }
   0x1   :  { %s8_s11 = sshll.u32 %s782_s0, 4  ;;  %s9_s11 = int_to_ptr.hbm [resolvable:$true] %s8_s11 }
   0x2   :  { %11 = dma.hbm_to_smem %s9_s11, 16, %s621_s12, [#allocation2] }
   0x3   :  { %587 = dma.done.wait [#allocation2], 16 }
   0x4   :  { %588 = vsyncadd [#allocation2], 4294967280 }
   0x5   :  { %14 = sfence }
   0x6   :  { %15 = vsyncpa [#allocation5], 0 }
   0x7   :  { %17 = vsyncpa [#allocation5 + $0x1], 0 }
   0x8   :  { %18 = vsyncpa [#allocation6], 0 }
   0x9   :  { %20 = vsyncpa [#allocation6 + $0x1], 0  ;;  %s645_s13 = smov 0   ;;  %s647_s14 = smov 0  }
   0xa   :  { %s649_s15 = smov 0   ;;  %s651_s16 = smov 0  }
   0xb   :  { %s653_s17 = smov 0   ;;  %s655_s0 = smov 0  }
   0xc LB: > { %s406_s18 = sadd.s32 4294967295, %s619_s0   ;;  %s407_s19 = sadd.s32 4294967294, %s619_s0   ;;  %s619_s0 = sphi %s655_s0, %s26_s0   ;;  %s615_s17 = sphi %s653_s17, %s793_s17   ;;  %s611_s16 = sphi %s651_s16, %s792_s16   ;;  %s607_s15 = sphi %s649_s15, %s791_s15   ;;  %s603_s14 = sphi %s647_s14, %s790_s14   ;;  %s599_s13 = sphi %s645_s13, %s789_s13  }
   0xd   : > { %s38_s20 = sadd.s32 1, %s615_s17  ;;  %s47_s21 = sadd.s32 1, %s607_s15 }
   0xe   : > { %p40_p0 = scmp.ge.s32.totalorder %s38_s20, 2  ;;  %p54_p1 = scmp.ne.s32.totalorder %s607_s15, %s603_s14 }
   0xf   : > { %p55_p2 = scmp.eq.s32.totalorder %s619_s0, 0  ;;  %p60_p3 = scmp.ne.s32.totalorder %s603_s14, %s599_s13 }
  0x10   : > { %s795_s20 = smov (%p40_p0, %s38_s20), 0  ;;  %p61_p5 = scmp.eq.s32.totalorder %s406_s18, 0 }
  0x11   : > { %p686_p4 = por %p55_p2, %p54_p1  ;;  %s42_s23 = ssub.s32 %s615_s17, %s795_s20 }
  0x12   : > { %p86_p6 = scmp.eq.s32.totalorder %s406_s18, 1  ;;  %p45_p7 = scmp.eq.s32.totalorder %s42_s23, 0 }
  0x13   : > { %p692_p8 = por %p61_p5, %p60_p3  ;;  %p92_p10 = scmp.eq.s32.totalorder %s407_s19, 1 }
  0x14   : > { %p696_p9 = por %p86_p6, %p54_p1  ;;  %p409_p12 = scmp.ge.s32.totalorder %s619_s0, 2 }
  0x15   : > { %s701_s26 = scalar_select %p45_p7, %s607_s15, %s47_s21  }
  0x16   : > { %p703_p11 = por %p92_p10, %p60_p3  ;;  %p435_p13 = scmp.lt.s32.totalorder %s619_s0, 2 }
  0x17   : > { %s112_s28 = sand.u32 1, %s607_s15   ;;  %s420_s30 = smul.u32 24, %s615_s17 }
  0x18   : > { %s419_s29 = smul.u32 24, %s112_s28  ;;  %p428_p0 = pnand %p435_p13, %p686_p4 }
  0x19   : > { %s122_s5 = scalar_lea.hbm %s783_s1, %s420_s30  ;;  %p411_p1 = scmp.ge.s32.totalorder %s619_s0, 1 }
  0x1a   : > { %s116_s6 = scalar_lea.vmem [#allocation4], %s419_s29  ;;  %s123_s8 = sshll.u32 %s122_s5, 4  ;;  %s124_s8 = int_to_ptr.hbm [resolvable:$true] %s123_s8 }
  0x1b   : > { %s125_s7 = sshll.u32 %s116_s6, 4  ;;  %s113_s9 = scalar_lea.sflag [#allocation5], %s112_s28  ;;  %s126_s7 = int_to_ptr.vmem [resolvable:$true] %s125_s7 }
  0x1c   : > { %s622_s10 = smov 128   ;;  %s623_s11 = smov 8  }
  0x1d   : > { %430 = dma.hbm_to_vmem [thread:$0]  (!%p428_p0), %s124_s8, 384, %s126_s7, %s113_s9, %s622_s10, %s622_s10, %s623_s11  }
  0x1e   : > { %p133_p2 = scmp.lt.s32.totalorder %s619_s0, 3 }
  0x20   : > { %p134_p3 = pnand %p411_p1, %p133_p2 }
  0x21   : > { %s719_s12 = sand.u32 (!%p134_p3), 1, %s603_s14  }
  0x22   : > { %137 = sbr.rel (%p134_p3) target bundleno = 153 (0x99), region = 24  ;;  %s140_s19 = scalar_lea.sflag (!%p134_p3), [#allocation5], %s719_s12 }
  0x23   : > { %s421_s18 = smul.u32 (!%p134_p3), 24, %s719_s12 }
  0x25   : > { %s143_s21 = scalar_lea.vmem (!%p134_p3), [#allocation4], %s421_s18 }
  0x27   : > { %590 = dma.done.wait (%p692_p8), %s140_s19, 384  }
  0x28   : > { %592 = vsyncadd (%p692_p8), %s140_s19, 4294966912  ;;  %s163_s22 = smul.u32 6, %s611_s16  ;;  %s732_s10 = scalar_lea.vmem [#allocation7], %s421_s18 }
  0x2a   : > { %s164_s23 = sld [smem:[#allocation3 + %s163_s22]]  ;;  %s165_s28 = sadd.s32 1, %s163_s22 }
  0x2b   : > { %s166_s29 = sld [smem:[#allocation3 + %s165_s28]]  ;;  %s167_s30 = sadd.s32 2, %s163_s22 }
  0x2c   : > { %s168_s3 = sld [smem:[#allocation3 + %s167_s30]]  ;;  %s169_s4 = sadd.s32 3, %s163_s22 }
  0x2d   : > { %s728_s5 = sld [smem:[#allocation3 + %s169_s4]]  ;;  %s171_s6 = sadd.s32 4, %s163_s22 }
  0x2e   : > { %s730_s7 = sld [smem:[#allocation3 + %s171_s6]]  ;;  %s173_s8 = sadd.s32 5, %s163_s22 }
  0x2f   : > { %s174_s9 = sld [smem:[#allocation3 + %s173_s8]] }
  0x30   : > { %p175_p4 = scmp.le.f32.partialorder %s164_s23, 0.5 }
  0x31   : > { %v179_v0 = vld [vmem:[%s143_s21] sm:$0xff] (%p175_p4)  ;;  %v180_v1 = vld [vmem:[%s143_s21 + $0x8] sm:$0xff] (%p175_p4)  ;;  %v181_v2 = vld [vmem:[%s143_s21 + $0x10] sm:$0xff] (%p175_p4) }
  0x32   : > { %178 = sbr.rel (!%p175_p4) target bundleno = 55 (0x37), region = 32  ;;  %182 = vst [vmem:[%s732_s10] sm:$0xff] (%p175_p4), %v179_v0 }
  0x33   : > { %183 = vst [vmem:[%s732_s10 + $0x8] sm:$0xff] (%p175_p4), %v180_v1 }
  0x34   : > { %184 = vst [vmem:[%s732_s10 + $0x10] sm:$0xff] (%p175_p4), %v181_v2 }
  0x37 PF: > { %p185_p5 = scmp.gt.f32.partialorder %s164_s23, 0.5 }
  0x38   : > { %v189_v3 = vld [vmem:[%s143_s21] sm:$0xff] (%p185_p5)  ;;  %v412_v4 = vld [vmem:[%s143_s21 + $0x8] sm:$0xff] (%p185_p5)  ;;  %v413_v5 = vld [vmem:[%s143_s21 + $0x10] sm:$0xff] (%p185_p5)  ;;  %v194_v6 = vstv (%p185_p5), %s166_s29  ;;  %s201_s24 = ssub.f32 (%p185_p5), 1.0, %s168_s3  ;;  %vm624_vm3 = vmmov (%p185_p5), 1  }
  0x39   : > { %188 = sbr.rel (!%p185_p5) target bundleno = 136 (0x88), region = 36  ;;  %v195_v7 = vmul.f32 (%p185_p5), %v194_v6, %v189_v3  ;;  %v197_v8 = vmul.f32 (%p185_p5), %v412_v4, %v194_v6  ;;  %v199_v9 = vmul.f32 (%p185_p5), %v413_v5, %v194_v6  ;;  %v203_v10 = vstv (%p185_p5), %s168_s3  ;;  %s222_s18 = ssub.f32 (%p185_p5), 1.0, %s728_s5 }
  0x3a   : > { %s202_s11 = smul.f32 (%p185_p5), %s201_s24, %s174_s9  ;;  %v225_v30 = vstv (%p185_p5), %s728_s5  ;;  %v269_v6 = vstv (%p185_p5), %s730_s7 }
  0x3b   : > { %v196_v11 = vmin.f32 (%p185_p5), %v195_v7, 1.0  ;;  %v198_v12 = vmin.f32 (%p185_p5), %v197_v8, 1.0  ;;  %v200_v13 = vmin.f32 (%p185_p5), %v199_v9, 1.0  ;;  %v223_v32 = vstv (%p185_p5), %s222_s18 }
  0x3c   : > { %v205_v14 = vstv (%p185_p5), %s202_s11 }
  0x3d   : > { %v204_v15 = vmul.f32 (%p185_p5), %v203_v10, %v196_v11  ;;  %v209_v16 = vmul.f32 (%p185_p5), %v203_v10, %v198_v12  ;;  %v213_v17 = vmul.f32 (%p185_p5), %v203_v10, %v200_v13 }
  0x3f   : > { %v206_v18 = vadd.f32 %v205_v14, %v204_v15  ;;  %v210_v19 = vadd.f32 %v209_v16, %v205_v14  ;;  %v214_v20 = vadd.f32 %v213_v17, %v205_v14 }
  0x41   : > { %v207_v21 = vmax.f32 %v206_v18, 0.0  ;;  %v211_v22 = vmax.f32 %v210_v19, 0.0  ;;  %v215_v23 = vmax.f32 %v214_v20, 0.0 }
  0x43   : > { %v208_v24 = vmin.f32 %v207_v21, 1.0  ;;  %v212_v25 = vmin.f32 %v211_v22, 1.0  ;;  %v216_v26 = vmin.f32 %v215_v23, 1.0 }
  0x45   : > { %v217_v27 = vmul.f32 0.2989, %v208_v24  ;;  %v218_v28 = vmul.f32 0.587, %v212_v25  ;;  %v220_v29 = vmul.f32 0.114, %v216_v26  ;;  %v226_v34 = vmul.f32 %v225_v30, %v208_v24 }
  0x46   : > { %v230_v35 = vmul.f32 %v225_v30, %v212_v25  ;;  %v234_v36 = vmul.f32 %v225_v30, %v216_v26 }
  0x47   : > { %v219_v31 = vadd.f32 %v218_v28, %v217_v27 }
  0x49   : > { %v221_v33 = vadd.f32 %v220_v29, %v219_v31 }
  0x4b   : > { %v224_v37 = vmul.f32 %v223_v32, %v221_v33 }
  0x4d   : > { %v227_v38 = vadd.f32 %v226_v34, %v224_v37  ;;  %v231_v39 = vadd.f32 %v230_v35, %v224_v37  ;;  %v235_v40 = vadd.f32 %v234_v36, %v224_v37 }
  0x4f   : > { %v228_v41 = vmax.f32 %v227_v38, 0.0  ;;  %v232_v42 = vmax.f32 %v231_v39, 0.0  ;;  %v236_v43 = vmax.f32 %v235_v40, 0.0 }
  0x51   : > { %v229_v44 = vmin.f32 %v228_v41, 1.0  ;;  %v233_v45 = vmin.f32 %v232_v42, 1.0  ;;  %v237_v46 = vmin.f32 %v236_v43, 1.0 }
  0x53   : > { %v238_v47 = vmax.f32 %v229_v44, %v233_v45  ;;  %v240_v48 = vmin.f32 %v229_v44, %v233_v45 }
  0x55   : > { %v239_v49 = vmax.f32 %v238_v47, %v237_v46  ;;  %v241_v50 = vmin.f32 %v240_v48, %v237_v46 }
  0x57   : > { %v242_v51 = vsub.f32 %v239_v49, %v241_v50  ;;  %v246_v53 = vsub.f32 %v239_v49, %v229_v44  ;;  %v248_v54 = vsub.f32 %v239_v49, %v233_v45  ;;  %v250_v55 = vsub.f32 %v239_v49, %v237_v46 }
  0x58   : > { %vm252_vm1 = vcmp.eq.f32.partialorder %v239_v49, %v229_v44  ;;  %vm253_vm2 = vcmp.eq.f32.partialorder %v239_v49, %v233_v45 }
  0x59   : > { %vm243_vm0 = vcmp.eq.f32.partialorder %v242_v51, 0.0  ;;  %vm254_vm4 = vmxor %vm252_vm1, %vm624_vm3 }
  0x5a   : > { %v244_v52 = vsel %vm243_vm0, 1.0, %v242_v51  ;;  %vm261_vm5 = vmxor %vm253_vm2, %vm624_vm3 }
  0x5b   : > { %491 = vrcp.f32 %v244_v52  ;;  %vm257_vm6 = vmand %vm253_vm2, %vm254_vm4 }
  0x5c   : > { %vm262_vm7 = vmand %vm261_vm5, %vm254_vm4 }
  0x61   : > { %v492_v56 = vpop.eup %491 }
  0x62   : > { %v247_v57 = vmul.f32 %v492_v56, %v246_v53  ;;  %v249_v58 = vmul.f32 %v492_v56, %v248_v54  ;;  %v251_v59 = vmul.f32 %v492_v56, %v250_v55 }
  0x64   : > { %v255_v60 = vsub.f32 %v251_v59, %v249_v58  ;;  %v258_v61 = vadd.f32 2.0, %v247_v57  ;;  %v263_v62 = vadd.f32 4.0, %v249_v58 }
  0x66   : > { %v256_v63 = vsel %vm252_vm1, %v255_v60, 0.0  ;;  %v259_v0 = vsub.f32 %v258_v61, %v251_v59  ;;  %v264_v1 = vsub.f32 %v263_v62, %v247_v57 }
  0x68   : > { %v260_v2 = vsel %vm257_vm6, %v259_v0, 0.0  ;;  %v265_v3 = vsel %vm262_vm7, %v264_v1, 0.0 }
  0x69   : > { %v266_v4 = vadd.f32 %v260_v2, %v256_v63 }
  0x6b   : > { %v267_v5 = vadd.f32 %v266_v4, %v265_v3 }
  0x6d   : > { %v268_v7 = vmul.f32 0.16666667, %v267_v5 }
  0x6f   : > { %v270_v8 = vadd.f32 %v269_v6, %v268_v7 }
  0x71   : > { %v271_v9 = vfloor.f32 %v270_v8 }
  0x73   : > { %v272_v10 = vsub.f32 %v270_v8, %v271_v9 }
  0x75   : > { %v273_v11 = vmul.f32 6.0, %v272_v10 }
  0x77   : > { %v274_v12 = vfloor.f32 %v273_v11 }
  0x79   : > { %v275_v13 = vmin.f32 %v274_v12, 5.0 }
  0x7b   : > { %v276_v14 = vsub.f32 %v273_v11, %v275_v13  ;;  %vm283_vm8 = vcmp.eq.f32.partialorder %v275_v13, 3.0  ;;  %vm284_vm9 = vcmp.eq.f32.partialorder %v275_v13, 4.0  ;;  %vm282_vm10 = vcmp.eq.f32.partialorder %v275_v13, 2.0 }
  0x7c   : > { %vm281_vm11 = vcmp.eq.f32.partialorder %v275_v13, 1.0  ;;  %vm280_vm12 = vcmp.eq.f32.partialorder %v275_v13, 0.0 }
  0x7d   : > { %v277_v15 = vmul.f32 %v276_v14, %v242_v51 }
  0x7f   : > { %v278_v16 = vsub.f32 %v239_v49, %v277_v15  ;;  %v279_v17 = vadd.f32 %v277_v15, %v241_v50 }
  0x81   : > { %v285_v18 = vsel %vm284_vm9, %v279_v17, %v239_v49  ;;  %v291_v19 = vsel %vm283_vm8, %v278_v16, %v241_v50  ;;  %v297_v20 = vsel %vm284_vm9, %v239_v49, %v278_v16 }
  0x82   : > { %v286_v21 = vsel %vm283_vm8, %v241_v50, %v285_v18  ;;  %v292_v22 = vsel %vm282_vm10, %v239_v49, %v291_v19  ;;  %v298_v23 = vsel %vm283_vm8, %v239_v49, %v297_v20 }
  0x83   : > { %v287_v24 = vsel %vm282_vm10, %v241_v50, %v286_v21  ;;  %v293_v25 = vsel %vm281_vm11, %v239_v49, %v292_v22  ;;  %v299_v26 = vsel %vm282_vm10, %v279_v17, %v298_v23 }
  0x84   : > { %v288_v27 = vsel %vm281_vm11, %v278_v16, %v287_v24  ;;  %v294_v28 = vsel %vm280_vm12, %v279_v17, %v293_v25  ;;  %v300_v29 = vsel %vm281_vm11, %v241_v50, %v299_v26 }
  0x85   : > { %v289_v30 = vsel %vm280_vm12, %v239_v49, %v288_v27  ;;  %414 = vst [vmem:[%s732_s10 + $0x8] sm:$0xff] %v294_v28  ;;  %v301_v31 = vsel %vm280_vm12, %v241_v50, %v300_v29 }
  0x86   : > { %290 = vst [vmem:[%s732_s10] sm:$0xff] %v289_v30 }
  0x87   : > { %415 = vst [vmem:[%s732_s10 + $0x10] sm:$0xff] %v301_v31 }
  0x88 PF: > { %s422_s19 = smul.u32 24, %s611_s16  ;;  %s318_s21 = sshll.u32 %s732_s10, 4  ;;  %s319_s21 = int_to_ptr.vmem [resolvable:$true] %s318_s21 }
  0x89   : > { %s305_s30 = scalar_lea.sflag [#allocation6], %s719_s12  ;;  %s555_s16 = scalar_lea.hbm %s784_s2, 48 }
  0x8a   : > { %s317_s28 = scalar_lea.hbm %s784_s2, %s422_s19 }
  0x8b   : > { %s320_s29 = sshll.u32 %s317_s28, 4  ;;  %s321_s29 = int_to_ptr.hbm [resolvable:$true] %s320_s29 }
  0x8c   : > { %s549_s3 = sshra.s32 %s321_s29, 4  ;;  %s550_s3 = int_to_ptr.hbm [resolvable:$true] %s549_s3 }
  0x8d   : > { %s551_s4 = scalar_lea.hbm %s550_s3, 24  ;;  %p556_p10 = scmp.lt.s32.totalorder %s550_s3, %s784_s2 }
  0x8e   : > { %p552_p6 = scmp.ne.s32.totalorder %s550_s3, %s551_s4  ;;  %p557_p13 = scmp.lt.s32.totalorder %s555_s16, %s551_s4 }
  0x90   : > { %p553_p7 = pnand %p552_p6, %p696_p9  ;;  %p558_p0 = por %p557_p13, %p556_p10 }
  0x92   : > { %p554_p8 = pneg %p553_p7 }
  0x94   : > { %p559_p1 = pnand %p558_p0, %p554_p8 }
  0x96   : > { %562 = shalt.err (!%p559_p1)
}
  0x97   : > { %s625_s12 = smov 128   ;;  %s626_s9 = smov 8  }
  0x98   : > { %425 = dma.vmem_to_hbm [thread:$0]  (%p696_p9), %s319_s21, 384, %s321_s29, %s305_s30, %s625_s12, %s625_s12, %s626_s9  }
  0x99 PF: > { %s335_s10 = sand.u32 1, %s599_s13   ;;  %p432_p2 = pnand %p409_p12, %p703_p11 }
  0x9a   : > { %s336_s24 = scalar_lea.sflag [#allocation6], %s335_s10 }
  0x9b   : > { %p433_p3 = pneg %p432_p2 }
  0x9d   : > { %594 = dma.done.wait (%p433_p3), %s336_s24, 384  }
  0x9e   : > { %596 = vsyncadd (%p433_p3), %s336_s24, 4294966912  ;;  %s26_s0 = sadd.s32 1, %s619_s0   ;;  %s789_s13 = smov %s603_s14 }
  0x9f   : > { %p23_p4 = scmp.ge.s32.totalorder %s26_s0, 4   ;;  %s790_s14 = smov %s607_s15 }
  0xa0   : > { %s791_s15 = smov %s701_s26  ;;  %s792_s16 = smov %s615_s17 }
  0xa1   : > { %s793_s17 = smov %s795_s20  ;;  %25 = sbr.rel (!%p23_p4) target bundleno = 12 (0xc), region = 81 }
  0xa6   :  { %342 = vsyncpa [#allocation5], 1 }
  0xa7   :  { %344 = vsyncpa [#allocation5 + $0x1], 1 }
  0xa8   :  { %345 = vsyncpa [#allocation6], 1 }
  0xa9   :  { %347 = vsyncpa [#allocation6 + $0x1], 1 }

</bundles_post_ra>
